<compile_context>
chip_gen: v6e
topology: v6e:2x2x1
jax: 0.10.0
libtpu: 0.0.40
codegen_flags: <defaults>
</compile_context>

<pallas_src>
import functools

import jax
import jax.numpy as jnp
from jax.experimental import pallas as pl
from jax.experimental.pallas import tpu as pltpu

_LANES = 128                  # vreg lane width
_BLOCK_ROWS = 8192            # (8192, 128) f32 block = 4 MiB per input per buffer
_VMEM_LIMIT = 48 << 20        # below physical VMEM on v5e/v6e (128 MiB) and v7x (64 MiB)


# ---------------------------------------------------------------------------
# Host-side layout helpers
# ---------------------------------------------------------------------------
def _flatten_aligned(x):
    """Split x (row-major) into a lane-dense (rows, 128) slab plus a ragged tail.

    The reshape of the aligned prefix is free; no full-tensor pad copy is made.
    Returns (slab, tail, rows) where tail has < 128 elements (possibly 0).
    """
    flat = x.reshape(-1)
    n = flat.shape[0]
    rows = n // _LANES
    n_aligned = rows * _LANES
    slab = flat[:n_aligned].reshape(rows, _LANES)
    tail = flat[n_aligned:]
    return slab, tail, rows


def _pad_rows(slab):
    """Round small slabs up to a multiple of 8 rows (<= 7 zero rows, ~3.5 KiB).

    Only done for whole-array blocks (rows <= _BLOCK_ROWS); larger slabs use
    8192-row blocks which are already sublane-aligned.
    """
    rows = slab.shape[0]
    if rows <= _BLOCK_ROWS:
        pad = (-rows) % 8
        if pad:
            slab = jnp.pad(slab, ((0, pad), (0, 0)))
    return slab


def _tiling(rows):
    """Pick block size, 2-way TensorCore split and row-mask requirement."""
    block_rows = rows if rows <= _BLOCK_ROWS else _BLOCK_ROWS
    tiles = -(-rows // block_rows)
    if tiles >= 2:
        # Always use both v7x TensorCores; odd tile counts over-cover and rely
        # on the in-kernel row-validity mask. No-op (just a 2-long outer loop)
        # on single-core v5e/v6e.
        splits, tiles_per = 2, -(-tiles // 2)
    else:
        splits, tiles_per = 1, 1
    needs_row_mask = splits * tiles_per * block_rows != rows
    return block_rows, tiles, splits, tiles_per, needs_row_mask


def _in_spec(block_rows, tiles, tiles_per):
    # Clamp the block index so over-coverage blocks never issue an OOB DMA;
    # their contribution is zeroed by the row-validity mask.
    return pl.BlockSpec(
        (block_rows, _LANES),
        lambda c, i: (jnp.minimum(c * tiles_per + i, tiles - 1), 0))


# ---------------------------------------------------------------------------
# In-kernel helpers
# ---------------------------------------------------------------------------
def _row_valid(shape, rows, block_rows, tiles_per):
    """Boolean (block_rows, 128) mask for rows that lie inside the real slab."""
    c = pl.program_id(0)
    i = pl.program_id(1)
    row0 = (c * tiles_per + i) * block_rows
    row_ids = row0 + jax.lax.broadcasted_iota(jnp.int32, shape, 0)
    return row_ids < rows


def _fold(block):
    """(block_rows, 128) f32 -> (1, 8, 128) via layout-preserving vreg adds."""
    return jnp.sum(block.reshape(-1, 8, _LANES), axis=0)[None]


# ---------------------------------------------------------------------------
# Kernels
# ---------------------------------------------------------------------------
def _sse_kernel(x_ref, y_ref, partial_ref, *,
                rows, block_rows, tiles_per, needs_row_mask):
    """Per-TensorCore partial sum of (y-x)^2 accumulated into the resident output."""
    i = pl.program_id(1)

    @pl.when(i == 0)
    def _():
        partial_ref[...] = jnp.zeros_like(partial_ref)

    d = y_ref[...].astype(jnp.float32) - x_ref[...].astype(jnp.float32)
    sq = d * d
    if needs_row_mask:
        # Applied on every step (not only the last block) because the 2-way
        # split may over-cover; this is pure VPU work and the kernel is
        # HBM-bound, so it is effectively free.
        sq = jnp.where(_row_valid(sq.shape, rows, block_rows, tiles_per), sq, 0.0)
    partial_ref[...] += _fold(sq)


def _masked_sse_kernel(x_ref, y_ref, m_ref, psq_ref, pm_ref, *,
                       rows, block_rows, tiles_per, needs_row_mask):
    """Partial sums of (y-x)^2 * m and of m; mask upcast in-kernel."""
    i = pl.program_id(1)

    @pl.when(i == 0)
    def _():
        psq_ref[...] = jnp.zeros_like(psq_ref)
        pm_ref[...] = jnp.zeros_like(pm_ref)

    d = y_ref[...].astype(jnp.float32) - x_ref[...].astype(jnp.float32)
    m = m_ref[...].astype(jnp.float32)
    sq = d * d * m
    if needs_row_mask:
        valid = _row_valid(sq.shape, rows, block_rows, tiles_per)
        sq = jnp.where(valid, sq, 0.0)
        m = jnp.where(valid, m, 0.0)
    psq_ref[...] += _fold(sq)
    pm_ref[...] += _fold(m)


def _square_dist_kernel(x_ref, y_ref, o_ref):
    """Elementwise (y - x)^2 for reduction='none'."""
    d = y_ref[...].astype(jnp.float32) - x_ref[...].astype(jnp.float32)
    o_ref[...] = (d * d).astype(o_ref.dtype)


# ---------------------------------------------------------------------------
# pallas_call wrappers
# ---------------------------------------------------------------------------
def _compiler_params():
    return pltpu.CompilerParams(
        dimension_semantics=("parallel", "arbitrary"),
        vmem_limit_bytes=_VMEM_LIMIT)


@jax.jit
def _l2_mean(inputs, outputs):
    out_dtype = jnp.result_type(inputs.dtype, outputs.dtype)
    n = inputs.size
    x2d, xt, rows = _flatten_aligned(inputs)
    y2d, yt, _ = _flatten_aligned(outputs)

    # Ragged tail (< 128 elements): fold with plain jnp, no full-tensor pad.
    tail_sse = jnp.float32(0.0)
    if xt.shape[0]:
        dt = yt.astype(jnp.float32) - xt.astype(jnp.float32)
        tail_sse = jnp.sum(dt * dt)

    if rows == 0:           # everything fit in the tail
        return (tail_sse / jnp.float32(n)).astype(out_dtype)

    x2d = _pad_rows(x2d)
    y2d = _pad_rows(y2d)
    rows_p = x2d.shape[0]
    block_rows, tiles, splits, tiles_per, needs_mask = _tiling(rows_p)
    assert block_rows % 8 == 0

    kernel = functools.partial(
        _sse_kernel, rows=rows_p, block_rows=block_rows,
        tiles_per=tiles_per, needs_row_mask=needs_mask)
    in_spec = _in_spec(block_rows, tiles, tiles_per)
    itemsize = jnp.dtype(inputs.dtype).itemsize

    partials = pl.pallas_call(
        kernel,
        out_shape=jax.ShapeDtypeStruct((splits, 8, _LANES), jnp.float32),
        grid_spec=pltpu.PrefetchScalarGridSpec(
            num_scalar_prefetch=0,
            grid=(splits, tiles_per),
            in_specs=[in_spec, in_spec],
            out_specs=pl.BlockSpec((1, 8, _LANES), lambda c, i: (c, 0, 0)),
        ),
        compiler_params=_compiler_params(),
        cost_estimate=pl.CostEstimate(
            flops=3 * n, transcendentals=0,
            bytes_accessed=2 * n * itemsize + splits * 8 * _LANES * 4),
    )(x2d, y2d)
    return ((jnp.sum(partials) + tail_sse) / jnp.float32(n)).astype(out_dtype)


@jax.jit
def _l2_mean_masked(inputs, outputs, mask):
    out_dtype = jnp.result_type(inputs.dtype, outputs.dtype)
    n = inputs.size
    if mask.dtype == jnp.bool_:
        mask = mask.astype(jnp.int8)     # bool -> i8 (kept narrow end-to-end)

    x2d, xt, rows = _flatten_aligned(inputs)
    y2d, yt, _ = _flatten_aligned(outputs)
    m2d, mt, _ = _flatten_aligned(mask)

    tail_sq = jnp.float32(0.0)
    tail_m = jnp.float32(0.0)
    if xt.shape[0]:
        dt = yt.astype(jnp.float32) - xt.astype(jnp.float32)
        mf = mt.astype(jnp.float32)
        tail_sq = jnp.sum(dt * dt * mf)
        tail_m = jnp.sum(mf)

    if rows == 0:
        return (tail_sq / tail_m).astype(out_dtype)

    x2d = _pad_rows(x2d)
    y2d = _pad_rows(y2d)
    m2d = _pad_rows(m2d)
    rows_p = x2d.shape[0]
    block_rows, tiles, splits, tiles_per, needs_mask = _tiling(rows_p)
    assert block_rows % 8 == 0

    kernel = functools.partial(
        _masked_sse_kernel, rows=rows_p, block_rows=block_rows,
        tiles_per=tiles_per, needs_row_mask=needs_mask)
    in_spec = _in_spec(block_rows, tiles, tiles_per)
    out_spec = pl.BlockSpec((1, 8, _LANES), lambda c, i: (c, 0, 0))
    itemsize = jnp.dtype(inputs.dtype).itemsize
    m_itemsize = jnp.dtype(mask.dtype).itemsize

    sq_part, m_part = pl.pallas_call(
        kernel,
        out_shape=(jax.ShapeDtypeStruct((splits, 8, _LANES), jnp.float32),
                   jax.ShapeDtypeStruct((splits, 8, _LANES), jnp.float32)),
        grid_spec=pltpu.PrefetchScalarGridSpec(
            num_scalar_prefetch=0,
            grid=(splits, tiles_per),
            in_specs=[in_spec, in_spec, in_spec],
            out_specs=(out_spec, out_spec),
        ),
        compiler_params=_compiler_params(),
        cost_estimate=pl.CostEstimate(
            flops=5 * n, transcendentals=0,
            bytes_accessed=(2 * itemsize + m_itemsize) * n
            + 2 * splits * 8 * _LANES * 4),
    )(x2d, y2d, m2d)
    # All-zero mask -> 0/0 = NaN, matching PyTorch's division-by-zero behavior.
    return ((jnp.sum(sq_part) + tail_sq)
            / (jnp.sum(m_part) + tail_m)).astype(out_dtype)


@jax.jit
def _l2_none(inputs, outputs):
    out_dtype = jnp.result_type(inputs.dtype, outputs.dtype)
    shape = inputs.shape
    n = inputs.size
    x2d, xt, rows = _flatten_aligned(inputs)
    y2d, yt, _ = _flatten_aligned(outputs)

    if rows == 0:           # tiny, not worth a kernel launch
        d = outputs.astype(jnp.float32) - inputs.astype(jnp.float32)
        return (d * d).astype(out_dtype)

    block_rows = rows if rows <= _BLOCK_ROWS else _BLOCK_ROWS
    tiles = -(-rows // block_rows)
    spec = pl.BlockSpec((block_rows, _LANES), lambda i: (i, 0))
    itemsize = jnp.dtype(inputs.dtype).itemsize

    sq2d = pl.pallas_call(
        _square_dist_kernel,
        out_shape=jax.ShapeDtypeStruct((rows, _LANES), out_dtype),
        grid_spec=pltpu.PrefetchScalarGridSpec(
            num_scalar_prefetch=0,
            grid=(tiles,),
            in_specs=[spec, spec],
            out_specs=spec,
        ),
        compiler_params=pltpu.CompilerParams(
            dimension_semantics=("parallel",),
            vmem_limit_bytes=_VMEM_LIMIT),
        cost_estimate=pl.CostEstimate(
            flops=2 * n, transcendentals=0,
            bytes_accessed=(2 * itemsize + jnp.dtype(out_dtype).itemsize) * n),
    )(x2d, y2d)

    flat = sq2d.reshape(-1)
    if xt.shape[0]:         # ragged tail handled with plain jnp and appended
        dt = yt.astype(jnp.float32) - xt.astype(jnp.float32)
        flat = jnp.concatenate([flat, (dt * dt).astype(out_dtype)])
    return flat.reshape(shape)


# ---------------------------------------------------------------------------
# Public API (equivalent of L2Loss.forward; `labels` is unused by the loss)
# ---------------------------------------------------------------------------
def l2_loss(inputs, outputs, reduction="mean", mask=None, labels=None):
    assert inputs.shape == outputs.shape
    if mask is not None:
        assert inputs.shape == mask.shape
    if reduction == "none":
        return _l2_none(inputs, outputs)
    if reduction == "mean":
        if mask is None:
            return _l2_mean(inputs, outputs)
        return _l2_mean_masked(inputs, outputs, mask)
    raise ValueError("Unknown reduction method: {}".format(reduction))


# ---------------------------------------------------------------------------
# Demo / self-check
# ---------------------------------------------------------------------------
if __name__ == "__main__":
    key = jax.random.PRNGKey(0)
    k1, k2, k3, k4, k5, k6 = jax.random.split(key, 6)

    # "EEG epoch"-like tensor; the module treats shape generically.
    shape = (2, 4, 16, 16)
    inputs = jax.random.normal(k1, shape, dtype=jnp.float32)
    outputs = jax.random.normal(k2, shape, dtype=jnp.float32)
    mask = (jax.random.uniform(k3, shape) > 0.5).astype(jnp.float32)

    out_mean = l2_loss(inputs, outputs, reduction="mean")
    ref_mean = jnp.mean((outputs - inputs) ** 2)

    out_mmean = l2_loss(inputs, outputs, reduction="mean", mask=mask)
    ref_mmean = jnp.sum((outputs - inputs) ** 2 * mask) / jnp.sum(mask)

    out_none = l2_loss(inputs, outputs, reduction="none")
    ref_none = (outputs - inputs) ** 2

    # Ragged (non-lane-aligned) shape exercising aligned-prefix + tail paths,
    # with a narrow int8 mask.
    rshape = (2, 200)
    rin = jax.random.normal(k4, rshape, dtype=jnp.float32)
    rout = jax.random.normal(k5, rshape, dtype=jnp.float32)
    rmask = (jax.random.uniform(k6, rshape) > 0.5).astype(jnp.int8)

    r_mean = l2_loss(rin, rout, reduction="mean")
    r_ref_mean = jnp.mean((rout - rin) ** 2)
    r_mmean = l2_loss(rin, rout, reduction="mean", mask=rmask)
    r_mf = rmask.astype(jnp.float32)
    r_ref_mmean = jnp.sum((rout - rin) ** 2 * r_mf) / jnp.sum(r_mf)
    r_none = l2_loss(rin, rout, reduction="none")
    r_ref_none = (rout - rin) ** 2

    jax.block_until_ready(
        (out_mean, out_mmean, out_none, r_mean, r_mmean, r_none))

    assert jnp.allclose(out_mean, ref_mean, rtol=1e-5, atol=1e-5)
    assert jnp.allclose(out_mmean, ref_mmean, rtol=1e-5, atol=1e-5)
    assert out_none.shape == shape
    assert jnp.allclose(out_none, ref_none, rtol=1e-5, atol=1e-5)
    assert jnp.allclose(r_mean, r_ref_mean, rtol=1e-5, atol=1e-5)
    assert jnp.allclose(r_mmean, r_ref_mmean, rtol=1e-5, atol=1e-5)
    assert r_none.shape == rshape
    assert jnp.allclose(r_none, r_ref_none, rtol=1e-5, atol=1e-5)

    print("KERNEL_OK")
</pallas_src>

<mosaic_0001>
module attributes {stable_mosaic.version = 11 : i64} {
  func.func @_sse_kernel(%arg0: i32, %arg1: i32, %arg2: memref<16x128xf32, #tpu.memory_space<vmem>>, %arg3: memref<16x128xf32, #tpu.memory_space<vmem>>, %arg4: memref<1x8x128xf32, #tpu.memory_space<vmem>>) attributes {dimension_semantics = [#tpu.dimension_semantics<parallel>, #tpu.dimension_semantics<arbitrary>], iteration_bounds = array<i64: 1, 1>, scalar_prefetch = 0 : i64, scratch_operands = 0 : i64, tpu.core_type = #tpu.core_type<tc>, window_params = [{transform_indices = @transform_0, window_bounds = array<i64: 16, 128>}, {transform_indices = @transform_1, window_bounds = array<i64: 16, 128>}, {transform_indices = @transform_2, window_bounds = array<i64: 1, 8, 128>}]} {
    %c0_i32 = arith.constant 0 : i32
    %0 = arith.cmpi eq, %arg1, %c0_i32 : i32
    %1 = arith.extui %0 : i1 to i32
    %c0_i32_0 = arith.constant 0 : i32
    %2 = arith.cmpi ne, %1, %c0_i32_0 : i32
    scf.if %2 {
      %cst_10 = arith.constant 0.000000e+00 : f32
      %13 = vector.broadcast %cst_10 : f32 to vector<1x8x128xf32>
      %c0_11 = arith.constant 0 : index
      %c0_12 = arith.constant 0 : index
      %c0_13 = arith.constant 0 : index
      %14 = vector.load %arg4[%c0_11, %c0_12, %c0_13] : memref<1x8x128xf32, #tpu.memory_space<vmem>>, vector<1x8x128xf32>
      tpu.vector_store %arg4[%c0_11, %c0_12, %c0_13], %13 {strides = array<i32>} : memref<1x8x128xf32, #tpu.memory_space<vmem>>, vector<1x8x128xf32>,
    } else {
    }
    %c0 = arith.constant 0 : index
    %c0_1 = arith.constant 0 : index
    %3 = vector.load %arg3[%c0, %c0_1] : memref<16x128xf32, #tpu.memory_space<vmem>>, vector<16x128xf32>
    %c0_2 = arith.constant 0 : index
    %c0_3 = arith.constant 0 : index
    %4 = vector.load %arg2[%c0_2, %c0_3] : memref<16x128xf32, #tpu.memory_space<vmem>>, vector<16x128xf32>
    %5 = arith.subf %3, %4 : vector<16x128xf32>
    %6 = arith.mulf %5, %5 : vector<16x128xf32>
    %c0_4 = arith.constant 0 : index
    %c0_5 = arith.constant 0 : index
    %c0_6 = arith.constant 0 : index
    %7 = vector.load %arg4[%c0_4, %c0_5, %c0_6] : memref<1x8x128xf32, #tpu.memory_space<vmem>>, vector<1x8x128xf32>
    %8 = vector.shape_cast %6 : vector<16x128xf32> to vector<2x8x128xf32>
    %cst = arith.constant dense<0.000000e+00> : vector<8x128xf32>
    %9 = vector.multi_reduction <add>, %8, %cst [0] : vector<2x8x128xf32> to vector<8x128xf32>
    %10 = vector.shape_cast %9 : vector<8x128xf32> to vector<1x8x128xf32>
    %11 = arith.addf %7, %10 : vector<1x8x128xf32>
    %c0_7 = arith.constant 0 : index
    %c0_8 = arith.constant 0 : index
    %c0_9 = arith.constant 0 : index
    %12 = vector.load %arg4[%c0_7, %c0_8, %c0_9] : memref<1x8x128xf32, #tpu.memory_space<vmem>>, vector<1x8x128xf32>
    tpu.vector_store %arg4[%c0_7, %c0_8, %c0_9], %11 {strides = array<i32>} : memref<1x8x128xf32, #tpu.memory_space<vmem>>, vector<1x8x128xf32>,
    return
  }
  func.func @transform_0(%arg0: i32, %arg1: i32) -> (i32, i32) {
    %c1_i32 = arith.constant 1 : i32
    %0 = arith.muli %arg0, %c1_i32 : i32
    %1 = arith.addi %0, %arg1 : i32
    %c0_i32 = arith.constant 0 : i32
    %2 = arith.minsi %1, %c0_i32 : i32
    %c0_i32_0 = arith.constant 0 : i32
    %c0_i32_1 = arith.constant 0 : i32
    return %2, %c0_i32_0 : i32, i32
  }
  func.func @transform_1(%arg0: i32, %arg1: i32) -> (i32, i32) {
    %c1_i32 = arith.constant 1 : i32
    %0 = arith.muli %arg0, %c1_i32 : i32
    %1 = arith.addi %0, %arg1 : i32
    %c0_i32 = arith.constant 0 : i32
    %2 = arith.minsi %1, %c0_i32 : i32
    %c0_i32_0 = arith.constant 0 : i32
    %c0_i32_1 = arith.constant 0 : i32
    return %2, %c0_i32_0 : i32, i32
  }
  func.func @transform_2(%arg0: i32, %arg1: i32) -> (i32, i32, i32) {
    %c0_i32 = arith.constant 0 : i32
    %c0_i32_0 = arith.constant 0 : i32
    %c0_i32_1 = arith.constant 0 : i32
    return %arg0, %c0_i32, %c0_i32_0 : i32, i32, i32
  }
}

</mosaic_0001>

<bundles_post_ra>
// kernel: _l2_mean.1
= control target key start
LH: loop header
LB: loop body
LE: loop exit
PB: predicated region body
PF: predicated region fallthrough
CT: control target
= control target key end

     0   :  { %s139_s0 = inlined_call_operand.vmem [shape: f32[16,128], index: 0, kind: input, shape index: {}]   ;;  %s140_s1 = inlined_call_operand.vmem [shape: f32[16,128], index: 1, kind: input, shape index: {}]   ;;  %s141_s2 = inlined_call_operand.vmem [shape: f32[1,8,128], index: 2, kind: output, shape index: {}]  }
   0x1   :  { %v80_v0 = vld [vmem:[%s140_s1] sm:$0xff]  ;;  %v81_v1 = vld [vmem:[%s140_s1 + $0x8] sm:$0xff] }
   0x2   :  { %v82_v2 = vld [vmem:[%s139_s0] sm:$0xff]  ;;  %v83_v3 = vld [vmem:[%s139_s0 + $0x8] sm:$0xff] }
   0x3   :  { %v84_v4 = vsub.f32 %v80_v0, %v82_v2  ;;  %v85_v5 = vsub.f32 %v81_v1, %v83_v3 }
   0x5   :  { %v86_v6 = vmul.f32 %v84_v4, %v84_v4  ;;  %v87_v7 = vmul.f32 %v85_v5, %v85_v5 }
   0x7   :  { %v89_v8 = vadd.f32 %v87_v7, %v86_v6 }
   0x9   :  { %91 = vst [vmem:[%s141_s2] sm:$0xff] %v89_v8 }

</bundles_post_ra>
